<compile_context>
chip_gen: v7x
topology: tpu7x:2x2x1
jax: 0.10.0
libtpu: 0.0.40
codegen_flags: <defaults>
</compile_context>

<pallas_src>
import functools

import jax
import jax.numpy as jnp
import numpy as np
from jax import lax
from jax.experimental import pallas as pl
from jax.experimental.pallas import tpu as pltpu

LN_EPS = 1e-5          # torch.nn.LayerNorm default eps
NEG_INF = -1e32        # fill value used by the PyTorch module


def _round_up(x, m):
    return -(-x // m) * m


def _vmem_capacity_bytes():
    try:
        info = pltpu.get_tpu_info()
        cap = getattr(info, "vmem_capacity_bytes", None)
        if cap:
            return int(cap)
    except Exception:
        pass
    return 64 << 20   # conservative default (v7x per-core VMEM)


def _hi_decoder_kernel(dec_ref,     # (TL, Hp)  bf16  decoder hidden-state tile
                       src_ref,     # (Hp, TN)  bf16  normalized + col-shifted src (NN layout)
                       bias_ref,    # (1, TN)   f32   additive padding bias (0 or -1e32, shifted)
                       seos_ref,    # (1, Hp)   f32   normalized src row at EOS position
                       gb_ref,      # (3, Hp)   f32   rows: LN gamma, LN beta, H-validity mask
                       logits_ref,  # (TL, TN)  out_dtype
                       xnorm_ref,   # (TL, Hp)  f32   scratch: cached normalized decoder tile
                       *, h_true: float):
    n = pl.program_id(2)

    # ---- LayerNorm + L2 normalization: once per (b, l) tile, cached in scratch -----
    @pl.when(n == 0)
    def _():
        x = dec_ref[...].astype(jnp.float32)
        gamma = gb_ref[0:1, :]
        beta = gb_ref[1:2, :]
        hmask = gb_ref[2:3, :]
        inv_h = 1.0 / h_true
        mean = jnp.sum(x, axis=-1, keepdims=True) * inv_h
        xc = (x - mean) * hmask                       # padded H columns -> 0 (two-pass LN)
        var = jnp.sum(xc * xc, axis=-1, keepdims=True) * inv_h
        y = xc * lax.rsqrt(var + LN_EPS) * gamma + beta
        # L2-normalize (no epsilon, matching PyTorch; all-zero padded L rows give NaN but
        # live only in the padded output region that is sliced off in the wrapper).
        y = y * lax.rsqrt(jnp.sum(y * y, axis=-1, keepdims=True))
        xnorm_ref[...] = y

    x = xnorm_ref[...]

    # ---- word scores, already in logits column layout: NN bf16 matmul on the MXU ----
    scores = lax.dot_general(
        x.astype(jnp.bfloat16), src_ref[...],
        dimension_numbers=(((1,), (0,)), ((), ())),
        preferred_element_type=jnp.float32)           # (TL, TN)

    # ---- additive padding mask (pre-shifted, EOS position pre-zeroed in wrapper) ----
    logits_ref[...] = (scores + bias_ref[...]).astype(logits_ref.dtype)

    # ---- dynamic EOS score: direct O(TL*H) f32 dot, narrow store into column 1 ------
    @pl.when(n == 0)
    def _():
        eos = jnp.sum(x * seos_ref[...], axis=-1, keepdims=True)   # (TL, 1)
        logits_ref[:, 1:2] = eos.astype(logits_ref.dtype)


def hi_decoder_forward(params, enc_output, src_embed, enc_src_len,
                       enc_padding_mask, dec_src_ids, dec_padding_mask=None,
                       *, out_dtype=jnp.bfloat16):
    """JAX/Pallas equivalent of HiDecoder.forward (static_eos=False, no prompt_pos_list)."""
    # TODO(synk): the wrapped external BART decoder stack (self.decoder) is not defined in
    # this module; it is replaced by its embedding-table lookup as a deterministic stand-in
    # (enc_output / causal_mask / dec_padding_mask only feed that external decoder).
    del enc_output, dec_padding_mask
    dec_hidden = params["embed_tokens"][dec_src_ids]                # (B, L, H)
    B, L, H = dec_hidden.shape
    N = src_embed.shape[1]
    f32 = jnp.float32
    out_itemsize = jnp.dtype(out_dtype).itemsize

    # ---- decoder-row tile: minimize L padding waste ---------------------------------
    H_pad = _round_up(H, 128)
    if L <= 128:
        TL = _round_up(L, 16)                         # 16 = bf16 native sublane tile
    else:
        TL = min((128, 256), key=lambda t: (_round_up(L, t) - L, -t))
    L_pad = _round_up(L, TL)
    num_l = L_pad // TL

    # ---- generation-aware VMEM budget and N tiling -----------------------------------
    vmem_cap = _vmem_capacity_bytes()
    vmem_budget = (vmem_cap * 3) // 4                 # headroom for Mosaic internal scratch

    def vmem_est(tn, src_bufs):
        return (2 * TL * H_pad * 2                    # dec tile (bf16), double-buffered
                + src_bufs * H_pad * tn * 2           # src tile (bf16)
                + 2 * tn * 4                          # additive bias
                + 2 * H_pad * 4                       # s_eos
                + 2 * 3 * H_pad * 4                   # gamma/beta/hmask
                + 2 * TL * tn * out_itemsize          # logits tile
                + TL * H_pad * 4)                     # xnorm scratch

    N_pad128 = _round_up(N, 128)
    if vmem_est(N_pad128, 2) <= vmem_budget:
        TN, src_bufs = N_pad128, 2                    # whole src resident, double-buffered
    elif vmem_est(N_pad128, 1) <= vmem_budget:
        TN, src_bufs = N_pad128, 1                    # whole src resident, single-buffered (v7x)
    else:
        src_bufs, TN = 2, 128
        for t in (4096, 3072, 2048, 1536, 1024, 768, 512, 384, 256, 128):
            if t < N_pad128 and vmem_est(t, 2) <= vmem_budget:
                TN = t
                break
    N_pad = _round_up(N, TN)
    num_n = N_pad // TN

    est = vmem_est(TN, src_bufs)
    vmem_limit = int(max(est + (2 << 20), min(vmem_budget, est + (4 << 20)), 16 << 20))

    # ---- staging (jnp.pad / concatenate; bf16 cast BEFORE padding / transposing) -----
    dec_p = jnp.pad(dec_hidden.astype(jnp.bfloat16),
                    ((0, 0), (0, L_pad - L), (0, H_pad - H)))

    src = src_embed.astype(f32)
    src_n = src * lax.rsqrt(jnp.sum(src * src, axis=-1, keepdims=True))     # (B, N, H)
    src_t = jnp.swapaxes(src_n.astype(jnp.bfloat16), 1, 2)                  # (B, H, N)
    # shift columns by one so the matmul directly emits logits layout:
    #   col 0 = word_scores[:,0];  col j>=2 = word_scores[:,j-1];  col 1 overwritten by EOS
    src_shift = jnp.concatenate([src_t[:, :, :1], src_t[:, :, :N - 1]], axis=2)
    src_shift = jnp.pad(src_shift, ((0, 0), (0, H_pad - H), (0, N_pad - N)))

    # normalized src row at the EOS position (dynamic-eos branch)
    # TODO(synk): enc_src_len == 0 (eos_idx == -1) is an undefined edge in the PyTorch module
    # (wraps to the last column); not specially handled here.
    eos_idx = enc_src_len.astype(jnp.int32) - 1
    s_eos = jnp.take_along_axis(src_n, eos_idx[:, None, None], axis=1)      # (B, 1, H) f32
    s_eos = jnp.pad(s_eos, ((0, 0), (0, 0), (0, H_pad - H)))

    # enc padding mask with the EOS position zeroed (in-place op in PyTorch), shifted like
    # the src columns, converted to an additive bias (0 = keep, -1e32 = masked).
    m = enc_padding_mask.astype(f32)
    m = m.at[jnp.arange(B), eos_idx].set(0.0)
    m_shift = jnp.concatenate([m[:, :1], m[:, :N - 1]], axis=1)             # (B, N)
    bias = jnp.where(m_shift == 0.0, NEG_INF, 0.0).astype(f32)
    bias = jnp.pad(bias, ((0, 0), (0, N_pad - N)), constant_values=NEG_INF)[:, None, :]

    gamma = params["ln_gamma"].reshape(1, H).astype(f32)
    beta = params["ln_beta"].reshape(1, H).astype(f32)
    hmask = jnp.ones((1, H), f32)
    gb = jnp.pad(jnp.concatenate([gamma, beta, hmask], axis=0),
                 ((0, 0), (0, H_pad - H)))                                  # (3, H_pad)

    # ---- 2-TC sharding: shard batch when possible so src traffic stays per-core disjoint
    if B >= 2:
        dim_sem = ("parallel", "arbitrary", "arbitrary")
    else:
        dim_sem = ("parallel", "parallel", "arbitrary")

    src_bytes = B * (num_l if num_n > 1 else 1) * H_pad * N_pad * 2
    cost = pl.CostEstimate(
        flops=2 * B * L_pad * N_pad * H_pad + 10 * B * L_pad * H_pad,
        transcendentals=3 * B * L_pad,
        bytes_accessed=B * L_pad * H_pad * 2 + src_bytes + B * L_pad * N_pad * out_itemsize,
    )

    kernel = functools.partial(_hi_decoder_kernel, h_true=float(H))

    src_idx = lambda b, l, n: (b, 0, n)
    if src_bufs == 1:
        src_spec = pl.BlockSpec((None, H_pad, TN), src_idx, pipeline_mode=pl.Buffered(1))
    else:
        src_spec = pl.BlockSpec((None, H_pad, TN), src_idx)

    grid_spec = pltpu.PrefetchScalarGridSpec(
        num_scalar_prefetch=0,
        grid=(B, num_l, num_n),
        in_specs=[
            pl.BlockSpec((None, TL, H_pad), lambda b, l, n: (b, l, 0)),   # dec hidden (bf16)
            src_spec,                                                      # src, (H, N) layout
            pl.BlockSpec((None, 1, TN), lambda b, l, n: (b, 0, n)),        # additive mask bias
            pl.BlockSpec((None, 1, H_pad), lambda b, l, n: (b, 0, 0)),     # normalized EOS row
            pl.BlockSpec((3, H_pad), lambda b, l, n: (0, 0)),              # gamma / beta / hmask
        ],
        out_specs=pl.BlockSpec((None, TL, TN), lambda b, l, n: (b, l, n)),
        scratch_shapes=[pltpu.VMEM((TL, H_pad), jnp.float32)],
    )

    out_padded = pl.pallas_call(
        kernel,
        out_shape=jax.ShapeDtypeStruct((B, L_pad, N_pad), out_dtype),
        grid_spec=grid_spec,
        compiler_params=pltpu.CompilerParams(
            dimension_semantics=dim_sem,
            vmem_limit_bytes=vmem_limit,
        ),
        cost_estimate=cost,
    )(dec_p, src_shift, bias, s_eos, gb)

    return out_padded[:, :L, :N]


def hi_decoder_reference(params, src_embed, enc_src_len, enc_padding_mask, dec_src_ids):
    """Pure-JAX f32 reference mirroring the PyTorch forward (dynamic-eos branch)."""
    dec_hidden = params["embed_tokens"][dec_src_ids].astype(jnp.float32)
    mean = dec_hidden.mean(-1, keepdims=True)
    var = ((dec_hidden - mean) ** 2).mean(-1, keepdims=True)
    dec_out = (dec_hidden - mean) / jnp.sqrt(var + LN_EPS)
    dec_out = dec_out * params["ln_gamma"] + params["ln_beta"]
    dec_n = dec_out / jnp.sqrt((dec_out * dec_out).sum(-1, keepdims=True))
    src_n = src_embed / jnp.sqrt((src_embed * src_embed).sum(-1, keepdims=True))
    ws = jnp.einsum("blh,bnh->bln", dec_n, src_n)
    B, L, N = ws.shape
    idx = enc_src_len - 1
    eos = jnp.take_along_axis(ws, idx[:, None, None], axis=2)              # (B, L, 1)
    mask = enc_padding_mask.astype(jnp.float32).at[jnp.arange(B), idx].set(0.0)
    wsm = jnp.where((mask == 0.0)[:, None, :], NEG_INF, ws)
    logits = jnp.full((B, L, N), NEG_INF, jnp.float32)
    logits = logits.at[:, :, 0:1].set(wsm[:, :, 0:1])
    logits = logits.at[:, :, 1:2].set(eos)
    logits = logits.at[:, :, 2:].set(wsm[:, :, 1:N - 1])
    return logits


if __name__ == "__main__":
    B, L, N, H, VOCAB = 2, 8, 16, 32, 50

    key = jax.random.PRNGKey(0)
    k1, k2, k3, k4, k5, k6 = jax.random.split(key, 6)

    params = {
        "embed_tokens": 0.5 * jax.random.normal(k1, (VOCAB, H), jnp.float32),
        "ln_gamma": 1.0 + 0.1 * jax.random.normal(k2, (1, H), jnp.float32),
        "ln_beta": 0.1 * jax.random.normal(k3, (1, H), jnp.float32),
    }
    # NOTE: self.lstm and the causal_mask buffer are created in __init__ but never used on the
    # implemented forward path (causal_mask only feeds the external decoder); dropout only
    # touches the static_eos branch (not taken).

    enc_output = jax.random.normal(k4, (B, N, H), jnp.float32)   # only used by external decoder
    src_embed = jax.random.normal(k5, (B, N, H), jnp.float32)
    dec_src_ids = jax.random.randint(k6, (B, L), 0, VOCAB)
    enc_src_len = jnp.array([12, 16], jnp.int32)
    enc_padding_mask = (jnp.arange(N)[None, :] < enc_src_len[:, None]).astype(jnp.float32)
    dec_padding_mask = jnp.ones((B, L), jnp.float32)

    out = hi_decoder_forward(params, enc_output, src_embed, enc_src_len,
                             enc_padding_mask, dec_src_ids, dec_padding_mask)
    out = jax.block_until_ready(out)

    ref = hi_decoder_reference(params, src_embed, enc_src_len,
                               enc_padding_mask, dec_src_ids)
    # Tolerance sized for bf16 MXU inputs / bf16 output (f32 accumulation in the kernel).
    np.testing.assert_allclose(np.asarray(out.astype(jnp.float32)), np.asarray(ref),
                               rtol=2e-2, atol=2e-2)

    assert out.shape == (B, L, N)
    print("KERNEL_OK")
</pallas_src>

<mosaic_0001>
module attributes {stable_mosaic.version = 11 : i64} {
  func.func @_hi_decoder_kernel(%arg0: i32, %arg1: i32, %arg2: i32, %arg3: memref<1x16x128xbf16, #tpu.memory_space<vmem>>, %arg4: memref<1x128x128xbf16, #tpu.memory_space<vmem>>, %arg5: memref<1x1x128xf32, #tpu.memory_space<vmem>>, %arg6: memref<1x1x128xf32, #tpu.memory_space<vmem>>, %arg7: memref<3x128xf32, #tpu.memory_space<vmem>>, %arg8: memref<1x16x128xbf16, #tpu.memory_space<vmem>>, %arg9: memref<16x128xf32, #tpu.memory_space<vmem>>) attributes {dimension_semantics = [#tpu.dimension_semantics<parallel>, #tpu.dimension_semantics<arbitrary>, #tpu.dimension_semantics<arbitrary>], iteration_bounds = array<i64: 2, 1, 1>, scalar_prefetch = 0 : i64, scratch_operands = 1 : i64, tpu.core_type = #tpu.core_type<tc>, window_params = [{transform_indices = @transform_0, window_bounds = array<i64: 1, 16, 128>}, {transform_indices = @transform_1, window_bounds = array<i64: 1, 128, 128>}, {transform_indices = @transform_2, window_bounds = array<i64: 1, 1, 128>}, {transform_indices = @transform_3, window_bounds = array<i64: 1, 1, 128>}, {pipeline_mode = #tpu.pipeline_mode<synchronous>, transform_indices = @transform_4, window_bounds = array<i64: 3, 128>}, {transform_indices = @transform_5, window_bounds = array<i64: 1, 16, 128>}]} {
    %c0_i32 = arith.constant 0 : i32
    %0 = arith.cmpi eq, %arg2, %c0_i32 : i32
    %1 = arith.extui %0 : i1 to i32
    %c0_i32_0 = arith.constant 0 : i32
    %2 = arith.cmpi ne, %1, %c0_i32_0 : i32
    scf.if %2 {
      %c0_13 = arith.constant 0 : index
      %c0_14 = arith.constant 0 : index
      %c0_15 = arith.constant 0 : index
      %19 = vector.load %arg3[%c0_13, %c0_14, %c0_15] : memref<1x16x128xbf16, #tpu.memory_space<vmem>>, vector<1x16x128xbf16>
      %20 = vector.shape_cast %19 : vector<1x16x128xbf16> to vector<16x128xbf16>
      %21 = arith.extf %20 : vector<16x128xbf16> to vector<16x128xf32>
      %c0_16 = arith.constant 0 : index
      %c0_17 = arith.constant 0 : index
      %22 = vector.load %arg7[%c0_16, %c0_17] : memref<3x128xf32, #tpu.memory_space<vmem>>, vector<1x128xf32>
      %c1 = arith.constant 1 : index
      %c0_18 = arith.constant 0 : index
      %23 = vector.load %arg7[%c1, %c0_18] : memref<3x128xf32, #tpu.memory_space<vmem>>, vector<1x128xf32>
      %c2 = arith.constant 2 : index
      %c0_19 = arith.constant 0 : index
      %24 = vector.load %arg7[%c2, %c0_19] : memref<3x128xf32, #tpu.memory_space<vmem>>, vector<1x128xf32>
      %cst_20 = arith.constant dense<0.000000e+00> : vector<16xf32>
      %25 = vector.multi_reduction <add>, %21, %cst_20 [1] : vector<16x128xf32> to vector<16xf32>
      %26 = vector.shape_cast %25 : vector<16xf32> to vector<16x1xf32>
      %cst_21 = arith.constant 3.125000e-02 : f32
      %27 = vector.broadcast %cst_21 : f32 to vector<16x1xf32>
      %28 = arith.mulf %26, %27 : vector<16x1xf32>
      %29 = vector.broadcast %28 : vector<16x1xf32> to vector<16x128xf32>
      %30 = arith.subf %21, %29 : vector<16x128xf32>
      %31 = vector.broadcast %24 : vector<1x128xf32> to vector<16x128xf32>
      %32 = arith.mulf %30, %31 : vector<16x128xf32>
      %33 = arith.mulf %32, %32 : vector<16x128xf32>
      %cst_22 = arith.constant dense<0.000000e+00> : vector<16xf32>
      %34 = vector.multi_reduction <add>, %33, %cst_22 [1] : vector<16x128xf32> to vector<16xf32>
      %35 = vector.shape_cast %34 : vector<16xf32> to vector<16x1xf32>
      %cst_23 = arith.constant 3.125000e-02 : f32
      %36 = vector.broadcast %cst_23 : f32 to vector<16x1xf32>
      %37 = arith.mulf %35, %36 : vector<16x1xf32>
      %cst_24 = arith.constant 9.99999974E-6 : f32
      %38 = vector.broadcast %cst_24 : f32 to vector<16x1xf32>
      %39 = arith.addf %37, %38 : vector<16x1xf32>
      %40 = math.rsqrt %39 : vector<16x1xf32>
      %41 = vector.broadcast %40 : vector<16x1xf32> to vector<16x128xf32>
      %42 = arith.mulf %32, %41 : vector<16x128xf32>
      %43 = vector.broadcast %22 : vector<1x128xf32> to vector<16x128xf32>
      %44 = arith.mulf %42, %43 : vector<16x128xf32>
      %45 = vector.broadcast %23 : vector<1x128xf32> to vector<16x128xf32>
      %46 = arith.addf %44, %45 : vector<16x128xf32>
      %47 = arith.mulf %46, %46 : vector<16x128xf32>
      %cst_25 = arith.constant dense<0.000000e+00> : vector<16xf32>
      %48 = vector.multi_reduction <add>, %47, %cst_25 [1] : vector<16x128xf32> to vector<16xf32>
      %49 = vector.shape_cast %48 : vector<16xf32> to vector<16x1xf32>
      %50 = math.rsqrt %49 : vector<16x1xf32>
      %51 = vector.broadcast %50 : vector<16x1xf32> to vector<16x128xf32>
      %52 = arith.mulf %46, %51 : vector<16x128xf32>
      %c0_26 = arith.constant 0 : index
      %c0_27 = arith.constant 0 : index
      %53 = vector.load %arg9[%c0_26, %c0_27] : memref<16x128xf32, #tpu.memory_space<vmem>>, vector<16x128xf32>
      tpu.vector_store %arg9[%c0_26, %c0_27], %52 {strides = array<i32>} : memref<16x128xf32, #tpu.memory_space<vmem>>, vector<16x128xf32>,
    } else {
    }
    %c0 = arith.constant 0 : index
    %c0_1 = arith.constant 0 : index
    %3 = vector.load %arg9[%c0, %c0_1] : memref<16x128xf32, #tpu.memory_space<vmem>>, vector<16x128xf32>
    %4 = arith.truncf %3 : vector<16x128xf32> to vector<16x128xbf16>
    %c0_2 = arith.constant 0 : index
    %c0_3 = arith.constant 0 : index
    %c0_4 = arith.constant 0 : index
    %5 = vector.load %arg4[%c0_2, %c0_3, %c0_4] : memref<1x128x128xbf16, #tpu.memory_space<vmem>>, vector<1x128x128xbf16>
    %6 = vector.shape_cast %5 : vector<1x128x128xbf16> to vector<128x128xbf16>
    %cst = arith.constant dense<0.000000e+00> : vector<16x128xf32>
    %7 = tpu.matmul %4, %6, %cst {dimension_numbers = #tpu.dot_dimension_numbers<[1], [0], [0], [1], [0, 0, 1, 1], [], []>} : vector<16x128xbf16>, vector<128x128xbf16>, vector<16x128xf32> -> vector<16x128xf32>
    %c0_5 = arith.constant 0 : index
    %c0_6 = arith.constant 0 : index
    %c0_7 = arith.constant 0 : index
    %8 = vector.load %arg5[%c0_5, %c0_6, %c0_7] : memref<1x1x128xf32, #tpu.memory_space<vmem>>, vector<1x1x128xf32>
    %9 = vector.shape_cast %8 : vector<1x1x128xf32> to vector<1x128xf32>
    %10 = vector.broadcast %9 : vector<1x128xf32> to vector<16x128xf32>
    %11 = arith.addf %7, %10 : vector<16x128xf32>
    %12 = arith.truncf %11 : vector<16x128xf32> to vector<16x128xbf16>
    %c0_8 = arith.constant 0 : index
    %c0_9 = arith.constant 0 : index
    %c0_10 = arith.constant 0 : index
    %13 = vector.load %arg8[%c0_8, %c0_9, %c0_10] : memref<1x16x128xbf16, #tpu.memory_space<vmem>>, vector<1x16x128xbf16>
    %14 = vector.shape_cast %13 : vector<1x16x128xbf16> to vector<16x128xbf16>
    %15 = vector.shape_cast %12 : vector<16x128xbf16> to vector<1x16x128xbf16>
    tpu.vector_store %arg8[%c0_8, %c0_9, %c0_10], %15 {strides = array<i32>} : memref<1x16x128xbf16, #tpu.memory_space<vmem>>, vector<1x16x128xbf16>,
    %c0_i32_11 = arith.constant 0 : i32
    %16 = arith.cmpi eq, %arg2, %c0_i32_11 : i32
    %17 = arith.extui %16 : i1 to i32
    %c0_i32_12 = arith.constant 0 : i32
    %18 = arith.cmpi ne, %17, %c0_i32_12 : i32
    scf.if %18 {
      %c0_13 = arith.constant 0 : index
      %c0_14 = arith.constant 0 : index
      %c0_15 = arith.constant 0 : index
      %19 = vector.load %arg6[%c0_13, %c0_14, %c0_15] : memref<1x1x128xf32, #tpu.memory_space<vmem>>, vector<1x1x128xf32>
      %20 = vector.shape_cast %19 : vector<1x1x128xf32> to vector<1x128xf32>
      %21 = vector.broadcast %20 : vector<1x128xf32> to vector<16x128xf32>
      %22 = arith.mulf %3, %21 : vector<16x128xf32>
      %cst_16 = arith.constant dense<0.000000e+00> : vector<16xf32>
      %23 = vector.multi_reduction <add>, %22, %cst_16 [1] : vector<16x128xf32> to vector<16xf32>
      %24 = vector.shape_cast %23 : vector<16xf32> to vector<16x1xf32>
      %25 = arith.truncf %24 : vector<16x1xf32> to vector<16x1xbf16>
      %c0_17 = arith.constant 0 : index
      %c0_18 = arith.constant 0 : index
      %c1 = arith.constant 1 : index
      %26 = vector.load %arg8[%c0_17, %c0_18, %c1] : memref<1x16x128xbf16, #tpu.memory_space<vmem>>, vector<1x16x1xbf16>
      %27 = vector.shape_cast %26 : vector<1x16x1xbf16> to vector<16x1xbf16>
      %28 = vector.shape_cast %25 : vector<16x1xbf16> to vector<1x16x1xbf16>
      tpu.vector_store %arg8[%c0_17, %c0_18, %c1], %28 {strides = array<i32>} : memref<1x16x128xbf16, #tpu.memory_space<vmem>>, vector<1x16x1xbf16>,
    } else {
    }
    return
  }
  func.func @transform_0(%arg0: i32, %arg1: i32, %arg2: i32) -> (i32, i32, i32) {
    %c0_i32 = arith.constant 0 : i32
    %c0_i32_0 = arith.constant 0 : i32
    return %arg0, %arg1, %c0_i32 : i32, i32, i32
  }
  func.func @transform_1(%arg0: i32, %arg1: i32, %arg2: i32) -> (i32, i32, i32) {
    %c0_i32 = arith.constant 0 : i32
    %c0_i32_0 = arith.constant 0 : i32
    return %arg0, %c0_i32, %arg2 : i32, i32, i32
  }
  func.func @transform_2(%arg0: i32, %arg1: i32, %arg2: i32) -> (i32, i32, i32) {
    %c0_i32 = arith.constant 0 : i32
    %c0_i32_0 = arith.constant 0 : i32
    return %arg0, %c0_i32, %arg2 : i32, i32, i32
  }
  func.func @transform_3(%arg0: i32, %arg1: i32, %arg2: i32) -> (i32, i32, i32) {
    %c0_i32 = arith.constant 0 : i32
    %c0_i32_0 = arith.constant 0 : i32
    %c0_i32_1 = arith.constant 0 : i32
    return %arg0, %c0_i32, %c0_i32_0 : i32, i32, i32
  }
  func.func @transform_4(%arg0: i32, %arg1: i32, %arg2: i32) -> (i32, i32) {
    %c0_i32 = arith.constant 0 : i32
    %c0_i32_0 = arith.constant 0 : i32
    %c0_i32_1 = arith.constant 0 : i32
    return %c0_i32, %c0_i32_0 : i32, i32
  }
  func.func @transform_5(%arg0: i32, %arg1: i32, %arg2: i32) -> (i32, i32, i32) {
    %c0_i32 = arith.constant 0 : i32
    return %arg0, %arg1, %arg2 : i32, i32, i32
  }
}

</mosaic_0001>

<bundles_post_ra>
// kernel: tpu_custom_call.1
= control target key start
LH: loop header
LB: loop body
LE: loop exit
PB: predicated region body
PF: predicated region fallthrough
CT: control target
= control target key end

     0   :  { %s1353_s0 = inlined_call_operand.hbm [shape: bf16[2,16,128], index: 0, kind: input, shape index: {}]   ;;  %s1354_s1 = inlined_call_operand.hbm [shape: bf16[2,128,128], index: 1, kind: input, shape index: {}]   ;;  %s1355_s2 = inlined_call_operand.vmem [shape: f32[2,1,128], index: 2, kind: input, shape index: {}]   ;;  %s1356_s3 = inlined_call_operand.vmem [shape: f32[2,1,128], index: 3, kind: input, shape index: {}]   ;;  %s1357_s4 = inlined_call_operand.vmem [shape: f32[3,128], index: 4, kind: input, shape index: {}]   ;;  %s1358_s5 = inlined_call_operand.hbm [shape: bf16[2,16,128], index: 5, kind: output, shape index: {}]  }
   0x1   :  { %1362 = sst [smem:[#allocation12_spill]] %s1353_s0 }
   0x2   :  { %10 = vsyncpa [#allocation4], 0 }
   0x3   :  { %12 = vsyncpa [#allocation4 + $0x1], 0 }
   0x4   :  { %13 = vsyncpa [#allocation7], 0 }
   0x5   :  { %15 = vsyncpa [#allocation7 + $0x1], 0 }
   0x6   :  { %16 = vsyncpa [#allocation5], 0 }
   0x7   :  { %18 = vsyncpa [#allocation5 + $0x1], 0  ;;  %s1091_s18 = smov 0   ;;  %s1093_s19 = smov 0  }
   0x8   :  { %s1095_s20 = smov 0   ;;  %s1097_s21 = smov 0  }
   0x9   :  { %s1099_s22 = smov 0   ;;  %s1101_s23 = smov 0  }
   0xa LB: > { %s734_s24 = sadd.s32 4294967295, %s1048_s23   ;;  %s735_s25 = sadd.s32 4294967294, %s1048_s23   ;;  %s1048_s23 = sphi %s1101_s23, %s24_s23   ;;  %s1044_s22 = sphi %s1099_s22, %s1380_s22   ;;  %s1040_s21 = sphi %s1097_s21, %s1379_s21   ;;  %s1036_s20 = sphi %s1095_s20, %s1378_s20   ;;  %s1032_s19 = sphi %s1093_s19, %s1377_s19   ;;  %s1028_s18 = sphi %s1091_s18, %s1376_s18  }
   0xb   : > { %s43_s26 = sadd.s32 1, %s1044_s22  ;;  %s52_s27 = sadd.s32 1, %s1036_s20 }
   0xc   : > { %p45_p0 = scmp.ge.s32.totalorder %s43_s26, 2  ;;  %p59_p1 = scmp.ne.s32.totalorder %s1036_s20, %s1032_s19 }
   0xd   : > { %p60_p2 = scmp.eq.s32.totalorder %s1048_s23, 0  ;;  %p65_p3 = scmp.ne.s32.totalorder %s1032_s19, %s1028_s18 }
   0xe   : > { %s1382_s26 = smov (%p45_p0, %s43_s26), 0  ;;  %p66_p5 = scmp.eq.s32.totalorder %s734_s24, 0 }
   0xf   : > { %p1132_p4 = por %p60_p2, %p59_p1  ;;  %s47_s29 = ssub.s32 %s1044_s22, %s1382_s26 }
  0x10   : > { %p196_p6 = scmp.eq.s32.totalorder %s734_s24, 1  ;;  %p50_p7 = scmp.eq.s32.totalorder %s47_s29, 0 }
  0x11   : > { %p1138_p8 = por %p66_p5, %p65_p3  ;;  %p202_p10 = scmp.eq.s32.totalorder %s735_s25, 1 }
  0x12   : > { %p1142_p9 = por %p196_p6, %p59_p1  ;;  %p828_p13 = scmp.lt.s32.totalorder %s1048_s23, 2 }
  0x13   : > { %s1364_s30 = scalar_select %p1138_p8, 1, 0 }
  0x14   : > { %s1365_s6 = scalar_select %p1142_p9, 1, 0 }
  0x15   : > { %s1147_s7 = scalar_select %p50_p7, %s1036_s20, %s52_s27  }
  0x16   : > { %p1149_p11 = por %p202_p10, %p65_p3  ;;  %s1156_s9 = sand.u32 1, %s1036_s20  }
  0x17   : > { %s738_s10 = sshll.u32 %s1156_s9, 3  ;;  %s768_s11 = sshll.u32 %s1044_s22, 7 }
  0x18   : > { %s1366_s8 = scalar_select %p1149_p11, 1, 0 }
  0x19   : > { %s1367_s0 = sld [smem:[#allocation12_spill]]  ;;  %s229_s15 = scalar_lea.vmem [#allocation3], %s738_s10 }
  0x1a   : > { %s238_s16 = sshll.u32 %s229_s15, 4  ;;  %p1169_p0 = pnand %p828_p13, %p1132_p4  ;;  %s1165_s16 = int_to_ptr.vmem [resolvable:$true] %s238_s16 }
  0x1b   : > { %s226_s24 = scalar_lea.sflag [#allocation4], %s1156_s9 }
  0x1c   : > { %p904_p3 = pneg %p1169_p0 }
  0x1f   : > { %s1163_s14 = scalar_lea.hbm %s1367_s0, %s768_s11  ;;  %s907_s28 = scalar_lea.hbm %s1367_s0, 256 }
  0x20   : > { %s902_s25 = scalar_lea.hbm %s1163_s14, 128  ;;  %p908_p4 = scmp.lt.u32.totalorder %s1163_s14, %s1367_s0 }
  0x21   : > { %p903_p2 = scmp.ne.s32.totalorder %s1163_s14, %s902_s25  ;;  %p909_p7 = scmp.lt.u32.totalorder %s907_s28, %s902_s25 }
  0x22   : > { %p911_p13 = scmp.lt.u32.totalorder %s902_s25, %s1163_s14 }
  0x23   : > { %p905_p5 = pnand %p904_p3, %p903_p2  ;;  %p910_p10 = por %p909_p7, %p908_p4 }
  0x25   : > { %p906_p6 = pneg %p905_p5  ;;  %p912_p12 = por %p911_p13, %p910_p10 }
  0x27   : > { %p913_p1 = pnand %p912_p12, %p906_p6 }
  0x29   : > { %916 = shalt.err (!%p913_p1)
}
  0x2a   : > { %s917_s12 = scalar_lea.vmem %s1165_s16, 128  ;;  %s1050_s13 = smov [#allocation3]  }
  0x2b   : > { %p918_p2 = scmp.ne.s32.totalorder %s1165_s16, %s917_s12  ;;  %s922_s15 = sshll.u32 %s1050_s13, 4  ;;  %s923_s15 = int_to_ptr.vmem [resolvable:$false] %s922_s15 }
  0x2c   : > { %s924_s27 = scalar_lea.vmem %s923_s15, 256  ;;  %p925_p9 = scmp.lt.s32.totalorder %s1165_s16, %s923_s15 }
  0x2d   : > { %p920_p5 = pnand %p918_p2, %p904_p3  ;;  %p926_p4 = scmp.lt.s32.totalorder %s924_s27, %s917_s12 }
  0x2f   : > { %p921_p11 = pneg %p920_p5  ;;  %p927_p7 = por %p926_p4, %p925_p9 }
  0x31   : > { %p928_p10 = pnand %p927_p7, %p921_p11 }
  0x33   : > { %931 = shalt.err (!%p928_p10)
}
  0x34   : > { %s1360_s25 = smov 64   ;;  %s1052_s29 = smov 4  }
  0x35   : > { %820 = dma.hbm_to_vmem [thread:$0]  (!%p1169_p0), %s1163_s14, 128, %s1165_s16, %s226_s24, %s1360_s25, %s1360_s25, %s1052_s29  }
  0x36   : > { %p283_p9 = scmp.lt.s32.totalorder %s1048_s23, 3  ;;  %s741_s28 = sshll.u32 %s1156_s9, 6 }
  0x37   : > { %s769_s10 = sshll.u32 %s1044_s22, 10  ;;  %p1369_p11 = scmp.ge.s32.totalorder %s1048_s23, 1 }
  0x38   : > { %s1217_s15 = scalar_lea.hbm %s1354_s1, %s769_s10  ;;  %s252_s27 = scalar_lea.vmem [#allocation6], %s741_s28 }
  0x39   : > { %p1210_p12 = pnand %p1369_p11, %p283_p9  ;;  %s260_s0 = sshll.u32 %s252_s27, 4  ;;  %s1219_s0 = int_to_ptr.vmem [resolvable:$true] %s260_s0 }
  0x3a   : > { %s249_s14 = scalar_lea.sflag [#allocation7], %s1156_s9  ;;  %s932_s16 = scalar_lea.hbm %s1217_s15, 1024 }
  0x3b   : > { %p933_p1 = scmp.ne.s32.totalorder %s1217_s15, %s932_s16  ;;  %s937_s10 = scalar_lea.hbm %s1354_s1, 2048 }
  0x3c   : > { %p938_p2 = scmp.lt.u32.totalorder %s1217_s15, %s1354_s1  ;;  %p939_p5 = scmp.lt.u32.totalorder %s937_s10, %s932_s16 }
  0x3d   : > { %p935_p6 = pnand %p933_p1, %p904_p3  ;;  %p941_p7 = scmp.lt.u32.totalorder %s932_s16, %s1217_s15 }
  0x3e   : > { %p940_p4 = por %p939_p5, %p938_p2 }
  0x3f   : > { %p936_p13 = pneg %p935_p6 }
  0x40   : > { %p942_p10 = por %p941_p7, %p940_p4 }
  0x42   : > { %p943_p9 = pnand %p942_p10, %p936_p13 }
  0x44   : > { %946 = shalt.err (!%p943_p9)
}
  0x45   : > { %s947_s28 = scalar_lea.vmem %s1219_s0, 1024  ;;  %s1053_s25 = smov [#allocation6]  }
  0x46   : > { %p948_p11 = scmp.ne.s32.totalorder %s1219_s0, %s947_s28  ;;  %s952_s27 = sshll.u32 %s1053_s25, 4  ;;  %s953_s27 = int_to_ptr.vmem [resolvable:$false] %s952_s27 }
  0x47   : > { %s954_s24 = scalar_lea.vmem %s953_s27, 2048  ;;  %p955_p8 = scmp.lt.s32.totalorder %s1219_s0, %s953_s27 }
  0x48   : > { %p950_p1 = pnand %p948_p11, %p904_p3  ;;  %p956_p2 = scmp.lt.s32.totalorder %s954_s24, %s947_s28 }
  0x4a   : > { %p951_p6 = pneg %p950_p1  ;;  %p957_p5 = por %p956_p2, %p955_p8 }
  0x4c   : > { %p958_p4 = pnand %p957_p5, %p951_p6 }
  0x4e   : > { %961 = shalt.err (!%p958_p4)
}
  0x4f   : > { %s1371_s16 = smov 64   ;;  %287 = sbr.rel (%p1210_p12) target bundleno = 803 (0x323), region = 40 }
  0x50   : > { %823 = dma.hbm_to_vmem [thread:$0]  (!%p1169_p0), %s1217_s15, 1024, %s1219_s0, %s249_s14, %s1371_s16, %s1371_s16, %s1052_s29  }
  0x51   : > { %s1253_s10 = sand.u32 (!%p1210_p12), 1, %s1032_s19   ;;  %p1372_p8 = scmp.ne.s32.totalorder (!%p1210_p12), %s1364_s30, 0 }
  0x52   : > { %s745_s12 = sshll.u32 (!%p1210_p12), %s1253_s10, 3  ;;  %s290_s17 = scalar_lea.sflag (!%p1210_p12), [#allocation4], %s1253_s10 }
  0x53   : > { %s293_s13 = scalar_lea.vmem (!%p1210_p12), [#allocation3], %s745_s12 }
  0x56   : > { %1015 = dma.done.wait (%p1372_p8), %s290_s17, 128  }
  0x57   : > { %1017 = vsyncadd (%p1372_p8), %s290_s17, 4294967168  ;;  %s746_s0 = sshll.u32 %s1253_s10, 6  ;;  %s299_s9 = scalar_lea.sflag [#allocation7], %s1253_s10 }
  0x58   : > { %s1265_s29 = scalar_lea.vmem [#allocation6], %s746_s0 }
  0x59   : > { %1019 = dma.done.wait (%p1372_p8), %s299_s9, 1024  }
  0x5a   : > { %1021 = vsyncadd (%p1372_p8), %s299_s9, 4294966272  ;;  %v774_v0 = vld [vmem:[%s293_s13] sm:$0xff]   ;;  %v886_v14 = vld [vmem:[%s1265_s29] sm:$0xff]   ;;  %v1054_v15 = vmov 0.0   ;;  %vm1055_vm0 = vmmov 0   ;;  %p344_p0 = scmp.lt.s32.totalorder %s1040_s21, 1  ;;  %v564_v53 = vlaneseq }
  0x5b   : > { %v775_v1 = vunpack.c.l.bf16 %v774_v0  ;;  %v776_v2 = vunpack.c.h.bf16 %v774_v0  ;;  %v748_v5 = vld [vmem:[%s1357_s4 + $0x2] ss:$0 sm:$0xff]  ;;  %791 = vmatprep.subr.bf16.mxu0 %v1054_v15  ;;  %v887_v16 = vld [vmem:[%s1265_s29 + $0x8] sm:$0xff]   ;;  %v749_v25 = vld [vmem:[%s1357_s4] ss:$0 sm:$0xff]  ;;  %807 = vmatprep.mubr.msk.bf16.mxu0 %vm1055_vm0, %v1054_v15  ;;  %s772_s15 = sshll.u32 %s1040_s21, 7 }
  0x5c   : > { %792 = vmatpush3.bf16.msra.mxu0 %v886_v14  ;;  %v888_v17 = vld [vmem:[%s1265_s29 + $0x10] sm:$0xff]   ;;  %v889_v36 = vld [vmem:[%s1265_s29 + $0x18] sm:$0xff]   ;;  %v890_v37 = vld [vmem:[%s1265_s29 + $0x20] sm:$0xff]   ;;  %s345_s27 = scalar_select %p344_p0, %s1040_s21, 1  ;;  %v1056_v51 = vmov 839922192  }
  0x5d   : > { %366 = vadd.xlane.f32.xlu0 %v775_v1  ;;  %793 = vmatprep.subr.bf16.mxu0 %v1054_v15  ;;  %v750_v27 = vld [vmem:[%s1357_s4 + $0x1] ss:$0 sm:$0xff]  ;;  %v891_v38 = vld [vmem:[%s1265_s29 + $0x28] sm:$0xff]   ;;  %v893_v40 = vld [vmem:[%s1265_s29 + $0x38] sm:$0xff]   ;;  %v562_v52 = vunpack.c.l.s4 %v1056_v51  ;;  %v1057_v54 = vmov 1985246804  }
  0x5e   : > { %v892_v39 = vld [vmem:[%s1265_s29 + $0x30] sm:$0xff]   ;;  %s352_s17 = scalar_lea.vmem %s1356_s3, %s345_s27  ;;  %v569_v55 = vunpack.c.l.s4 %v1057_v54  ;;  %s349_s9 = scalar_lea.vmem %s1355_s2, %s345_s27  ;;  %v565_v57 = vshrl.u32 %v564_v53, 7  ;;  %vm577_vm1 = vcmask 11272  }
  0x5f   : > { %v762_v44 = vld [vmem:[%s352_s17] ss:$0 sm:$0xff]  ;;  %v563_v56 = vunpack.c.0.s8 %v562_v52  ;;  %s342_s29 = scalar_lea.vmem [#allocation8], %s745_s12  ;;  %s1304_s12 = scalar_lea.hbm %s1358_s5, %s772_s15 }
  0x60   : > { %794 = vmatpush3.bf16.msra.mxu0 %v887_v16  ;;  %v570_v58 = vunpack.c.0.s8 %v569_v55  ;;  %v751_v60 = vld [vmem:[%s349_s9] ss:$0 sm:$0xff]  ;;  %s597_s11 = sshll.u32 %s342_s29, 4  ;;  %s581_s21 = scalar_lea.sflag [#allocation5], %s1253_s10  ;;  %s1299_s11 = int_to_ptr.vmem [resolvable:$true] %s597_s11 }
  0x61   : > { %368 = vadd.xlane.f32.xlu0 %v776_v2  ;;  %795 = vmatprep.subr.bf16.mxu0 %v1054_v15  ;;  %v566_v0 = vsub.s32 %v563_v56, %v565_v57  ;;  %s962_s28 = scalar_lea.vmem %s1299_s11, 128  ;;  %p1373_p12 = scmp.ne.s32.totalorder %s1365_s6, 0 }
  0x62   : > { %p963_p3 = scmp.ne.s32.totalorder %s1299_s11, %s962_s28  ;;  %s1058_s25 = smov [#allocation8]  }
  0x63   : > { %s966_s27 = sshll.u32 %s1058_s25, 4  ;;  %s967_s27 = int_to_ptr.vmem [resolvable:$false] %s966_s27 }
  0x64   : > { %796 = vmatpush3.bf16.msra.mxu0 %v888_v17  ;;  %p964_p13 = pnand %p963_p3, %p1373_p12  ;;  %s968_s24 = scalar_lea.vmem %s967_s27, 256 }
  0x65   : > { %797 = vmatprep.subr.bf16.mxu0 %v1054_v15  ;;  %p969_p10 = scmp.lt.s32.totalorder %s1299_s11, %s967_s27  ;;  %p970_p9 = scmp.lt.s32.totalorder %s968_s24, %s962_s28 }
  0x66   : > { %p965_p7 = pneg %p964_p13 }
  0x67   : > { %p971_p11 = por %p970_p9, %p969_p10 }
  0x68   : > { %798 = vmatpush3.bf16.msra.mxu0 %v889_v36 }
  0x69   : > { %799 = vmatprep.subr.bf16.mxu0 %v1054_v15  ;;  %p972_p1 = pnand %p971_p11, %p965_p7 }
  0x6c   : > { %800 = vmatpush3.bf16.msra.mxu0 %v890_v37 }
  0x6d   : > { %801 = vmatprep.subr.bf16.mxu0 %v1054_v15 }
  0x70   : > { %802 = vmatpush3.bf16.msra.mxu0 %v891_v38 }
  0x71   : > { %803 = vmatprep.subr.bf16.mxu0 %v1054_v15 }
  0x74   : > { %804 = vmatpush3.bf16.msra.mxu0 %v892_v39 }
  0x75   : > { %805 = vmatprep.subr.bf16.mxu0 %v1054_v15 }
  0x78   : > { %806 = vmatpush3.bf16.msra.mxu0 %v893_v40 }
  0xea   : > { %v367_v3 = vpop.xlane.xlu0 %366 }
  0xeb   : > { %v370_v4 = vmul.f32 0.03125, %v367_v3 }
  0xed   : > { %v372_v6 = vsub.f32 %v775_v1, %v370_v4  ;;  %v573_v1 = vsub.s32 %v570_v58, %v565_v57 }
  0xee   : > { %v369_v7 = vpop.xlane.xlu0 %368 }
  0xef   : > { %v371_v8 = vmul.f32 0.03125, %v369_v7  ;;  %v378_v9 = vmul.f32 %v748_v5, %v372_v6 }
  0xf1   : > { %v373_v10 = vsub.f32 %v776_v2, %v371_v8  ;;  %v380_v11 = vmul.f32 %v378_v9, %v378_v9 }
  0xf3   : > { %382 = vadd.xlane.f32.xlu1 %v380_v11  ;;  %v379_v12 = vmul.f32 %v748_v5, %v373_v10 }
  0xf5   : > { %v381_v13 = vmul.f32 %v379_v12, %v379_v12 }
  0xf7   : > { %384 = vadd.xlane.f32.xlu1 %v381_v13 }
 0x180   : > { %v383_v18 = vpop.xlane.xlu1 %382 }
 0x181   : > { %v386_v19 = vmul.f32 0.03125, %v383_v18 }
 0x183   : > { %v388_v20 = vadd.f32 1e-05, %v386_v19 }
 0x184   : > { %v385_v21 = vpop.xlane.xlu1 %384 }
 0x185   : > { %894 = vrsqrt.f32 %v388_v20  ;;  %v387_v22 = vmul.f32 0.03125, %v385_v21 }
 0x187   : > { %v389_v23 = vadd.f32 1e-05, %v387_v22 }
 0x189   : > { %896 = vrsqrt.f32 %v389_v23 }
 0x18f   : > { %v895_v24 = vpop.eup %894 }
 0x190   : > { %v392_v26 = vmul.f32 %v895_v24, %v378_v9 }
 0x192   : > { %v398_v28 = vmul.f32 %v749_v25, %v392_v26 }
 0x193   : > { %v897_v29 = vpop.eup %896 }
 0x194   : > { %v404_v30 = vadd.f32 %v750_v27, %v398_v28  ;;  %v393_v31 = vmul.f32 %v897_v29, %v379_v12 }
 0x196   : > { %v406_v32 = vmul.f32 %v404_v30, %v404_v30  ;;  %v399_v33 = vmul.f32 %v749_v25, %v393_v31 }
 0x198   : > { %408 = vadd.xlane.f32.xlu0 %v406_v32  ;;  %v405_v34 = vadd.f32 %v750_v27, %v399_v33 }
 0x19a   : > { %v407_v35 = vmul.f32 %v405_v34, %v405_v34 }
 0x19c   : > { %410 = vadd.xlane.f32.xlu1 %v407_v35 }
 0x225   : > { %v409_v41 = vpop.xlane.xlu0 %408 }
 0x226   : > { %898 = vrsqrt.f32 %v409_v41 }
 0x229   : > { %v411_v42 = vpop.xlane.xlu1 %410 }
 0x22a   : > { %900 = vrsqrt.f32 %v411_v42 }
 0x230   : > { %v899_v43 = vpop.eup %898 }
 0x231   : > { %v414_v45 = vmul.f32 %v899_v43, %v404_v30 }
 0x233   : > { %v553_v46 = vmul.f32 %v762_v44, %v414_v45 }
 0x234   : > { %v901_v47 = vpop.eup %900 }
 0x235   : > { %555 = vadd.xlane.f32.xlu0 %v553_v46  ;;  %v415_v48 = vmul.f32 %v901_v47, %v405_v34 }
 0x237   : > { %v554_v49 = vmul.f32 %v762_v44, %v415_v48  ;;  %v420_v50 = vpack.c.bf16 %v415_v48, %v414_v45 }
 0x239   : > { %557 = vadd.xlane.f32.xlu1 %v554_v49  ;;  %808 = vmatmul.mubr.bf16.vlgmr.msra.gmra.mrb[0].mxu0 %v420_v50 }
 0x2c2   : > { %v556_v62 = vpop.xlane.xlu0 %555 }
 0x2c6   : > { %v558_v59 = vpop.xlane.xlu1 %557 }
 0x2c7   : > { %v559_v2 = vpack.c.bf16 %v558_v59, %v556_v62 }
 0x2c9   : > { %v567_v8 = vrot.slane %v559_v2, %v566_v0  ;;  %v574_v9 = vrot.slane %v559_v2, %v573_v1 }
 0x30c   : > { %v526_v61 = vpop.f32.mrb[0].mxu0 }
 0x30d   : > { %v809_v63 = vpop.f32.mrb[1].mxu0  ;;  %v527_v4 = vadd.f32 %v751_v60, %v526_v61 }
 0x30e   : > { %v529_v3 = vpop.f32.mrb[2].mxu0 }
 0x30f   : > { %v530_v5 = vadd.f32 %v751_v60, %v529_v3  ;;  %v810_v6 = vpop.f32.mrb[3].mxu0 }
 0x311   : > { %v780_v7 = vpack.c.bf16 %v530_v5, %v527_v4 }
 0x313   : > { %781 = vst [vmem:[%s342_s29] sm:$0xff] %v780_v7  }
 0x314   : > { %578 = vst.msk [vmem:[%s342_s29] sm:$0xf] %vm577_vm1, %v567_v8  ;;  %579 = vst.msk [vmem:[%s342_s29 + $0x4] sm:$0xf] %vm577_vm1, %v574_v9 }
 0x315   : > { %975 = shalt.err (!%p972_p1)
}
 0x316   : > { %s976_s16 = scalar_lea.hbm %s1304_s12, 128  ;;  %s980_s0 = scalar_lea.hbm %s1358_s5, 256 }
 0x317   : > { %p977_p6 = scmp.ne.s32.totalorder %s1304_s12, %s976_s16  ;;  %p981_p4 = scmp.lt.u32.totalorder %s1304_s12, %s1358_s5 }
 0x318   : > { %p982_p8 = scmp.lt.u32.totalorder %s980_s0, %s976_s16  ;;  %p984_p3 = scmp.lt.u32.totalorder %s976_s16, %s1304_s12 }
 0x319   : > { %p978_p2 = pnand %p977_p6, %p1373_p12 }
 0x31a   : > { %p983_p0 = por %p982_p8, %p981_p4 }
 0x31b   : > { %p979_p5 = pneg %p978_p2 }
 0x31c   : > { %p985_p13 = por %p984_p3, %p983_p0 }
 0x31e   : > { %p986_p7 = pnand %p985_p13, %p979_p5 }
 0x320   : > { %989 = shalt.err (!%p986_p7)
}
 0x321   : > { %s1059_s15 = smov 64   ;;  %s1060_s30 = smov 4  }
 0x322   : > { %815 = dma.vmem_to_hbm [thread:$0]  (%p1373_p12), %s1299_s11, 128, %s1304_s12, %s581_s21, %s1059_s15, %s1059_s15, %s1060_s30  }
 0x323 PF: > { %s612_s14 = sand.u32 1, %s1028_s18   ;;  %p1374_p10 = scmp.ne.s32.totalorder %s1366_s8, 0 }
 0x324   : > { %p1375_p9 = scmp.ge.s32.totalorder %s1048_s23, 2  ;;  %s613_s28 = scalar_lea.sflag [#allocation5], %s612_s14 }
 0x326   : > { %p825_p11 = pnand %p1375_p9, %p1374_p10 }
 0x328   : > { %1023 = dma.done.wait (!%p825_p11), %s613_s28, 128  }
 0x329   : > { %1025 = vsyncadd (!%p825_p11), %s613_s28, 4294967168  ;;  %s24_s23 = sadd.s32 1, %s1048_s23   ;;  %s1376_s18 = smov %s1032_s19 }
 0x32a   : > { %p21_p1 = scmp.ge.s32.totalorder %s24_s23, 4   ;;  %s1377_s19 = smov %s1036_s20 }
 0x32b   : > { %s1378_s20 = smov %s1147_s7  ;;  %s1379_s21 = smov %s1044_s22 }
 0x32c   : > { %s1380_s22 = smov %s1382_s26  ;;  %23 = sbr.rel (!%p21_p1) target bundleno = 10 (0xa), region = 112 }
 0x333   :  { %618 = vsyncpa [#allocation4], 1 }
 0x334   :  { %620 = vsyncpa [#allocation4 + $0x1], 1 }
 0x335   :  { %621 = vsyncpa [#allocation7], 1 }
 0x336   :  { %623 = vsyncpa [#allocation7 + $0x1], 1 }
 0x337   :  { %624 = vsyncpa [#allocation5], 1 }
 0x338   :  { %626 = vsyncpa [#allocation5 + $0x1], 1 }

</bundles_post_ra>
